<compile_context>
chip_gen: v6e
topology: v6e:2x2x1
jax: 0.10.0
libtpu: 0.0.40
codegen_flags: <defaults>
</compile_context>

<pallas_src>
import functools
import numpy as np

import jax
import jax.numpy as jnp
from jax.experimental import pallas as pl
from jax.experimental.pallas import tpu as pltpu


# ----------------------------------------------------------------------------
# Helpers
# ----------------------------------------------------------------------------

def _round_up(x, m):
    return ((x + m - 1) // m) * m


def _pick_tile(dim_p):
    """Largest 128-multiple tile <= 512 that divides dim_p (dim_p is a 128-multiple)."""
    for t in (512, 384, 256, 128):
        if dim_p % t == 0:
            return t
    return 128


# ----------------------------------------------------------------------------
# Pallas kernels
# ----------------------------------------------------------------------------

def _gemm_kernel(a_ref, b_ref, bias_ref, *rest, relu, has_res, multi_k):
    """C = [relu](A @ B + bias [+ residual]); A,B are bf16 tiles, f32 accumulation."""
    if has_res:
        res_ref = rest[0]
        rest = rest[1:]
    else:
        res_ref = None

    def epilogue(acc):
        out = acc + bias_ref[...]
        if has_res:
            out = out + res_ref[...].astype(jnp.float32)
        if relu:
            out = jnp.maximum(out, 0.0)
        return out

    if not multi_k:
        (o_ref,) = rest
        acc = jnp.dot(a_ref[...], b_ref[...], preferred_element_type=jnp.float32)
        o_ref[...] = epilogue(acc).astype(o_ref.dtype)
    else:
        o_ref, acc_ref = rest

        @pl.when(pl.program_id(2) == 0)
        def _():
            acc_ref[...] = jnp.zeros_like(acc_ref)

        acc_ref[...] += jnp.dot(a_ref[...], b_ref[...],
                                preferred_element_type=jnp.float32)

        @pl.when(pl.program_id(2) == pl.num_programs(2) - 1)
        def _():
            o_ref[...] = epilogue(acc_ref[...]).astype(o_ref.dtype)


def _maxpool_kernel(ee_ref, eo_ref, oe_ref, oo_ref, o_ref, *, ho, wo):
    """3x3 stride-2 pad-1 max pool from even/odd quadrant views (9-tap running max)."""
    ee = ee_ref[0]
    eo = eo_ref[0]
    oe = oe_ref[0]
    oo = oo_ref[0]
    m = ee[:ho, :wo]
    m = jnp.maximum(m, ee[:ho, 1:wo + 1])
    m = jnp.maximum(m, ee[1:ho + 1, :wo])
    m = jnp.maximum(m, ee[1:ho + 1, 1:wo + 1])
    m = jnp.maximum(m, eo[:ho, :wo])
    m = jnp.maximum(m, eo[1:ho + 1, :wo])
    m = jnp.maximum(m, oe[:ho, :wo])
    m = jnp.maximum(m, oe[:ho, 1:wo + 1])
    m = jnp.maximum(m, oo[:ho, :wo])
    o_ref[0] = m


def _avgpool49_kernel(x_ref, o_ref):
    """Mean over the 49 spatial positions (axis=1) of a [TR, 49, C] tile."""
    o_ref[...] = jnp.mean(x_ref[...].astype(jnp.float32), axis=1)


def _ce_kernel(logits_ref, onehot_ref, o_ref):
    logits = logits_ref[...]
    m = jnp.max(logits, axis=-1, keepdims=True)
    lse = m + jnp.log(jnp.sum(jnp.exp(logits - m), axis=-1, keepdims=True))
    picked = jnp.sum(logits * onehot_ref[...], axis=-1, keepdims=True)
    o_ref[...] = jnp.mean(lse - picked, axis=0, keepdims=True)


# ----------------------------------------------------------------------------
# GEMM wrapper (traced inside jitted conv / linear builders)
# ----------------------------------------------------------------------------

def _gemm(xb, w, b, res, *, M, K, N, Kp, Np, relu, out_dtype):
    """y = [relu](x @ W + b [+ res]); xb [M,K] bf16, w [Kp,Np] bf16, b [1,Np] f32."""
    if M <= 256:
        Mp = _round_up(M, 16)
        tm = Mp
    else:
        tm = 128
        Mp = _round_up(M, tm)
    tn = _pick_tile(Np)
    tk = Kp if Kp <= 2304 else _pick_tile(Kp)   # collapse k-grid when K is small enough
    nk = Kp // tk
    multi_k = nk > 1

    if Mp != M or Kp != K:
        xb = jnp.pad(xb, ((0, Mp - M), (0, Kp - K)))

    args = [xb, w, b]
    in_specs = [
        pl.BlockSpec((tm, tk), lambda i, j, k: (i, k)),
        pl.BlockSpec((tk, tn), lambda i, j, k: (k, j)),
        pl.BlockSpec((1, tn), lambda i, j, k: (0, j)),
    ]
    has_res = res is not None
    if has_res:
        rb = res
        if Mp != M or Np != N:
            rb = jnp.pad(rb, ((0, Mp - M), (0, Np - N)))
        args.append(rb)
        in_specs.append(pl.BlockSpec((tm, tn), lambda i, j, k: (i, j)))

    scratch = [] if not multi_k else [pltpu.VMEM((tm, tn), jnp.float32)]

    out = pl.pallas_call(
        functools.partial(_gemm_kernel, relu=relu, has_res=has_res, multi_k=multi_k),
        out_shape=jax.ShapeDtypeStruct((Mp, Np), out_dtype),
        grid_spec=pltpu.PrefetchScalarGridSpec(
            num_scalar_prefetch=0,
            grid=(Mp // tm, Np // tn, nk),
            in_specs=in_specs,
            out_specs=pl.BlockSpec((tm, tn), lambda i, j, k: (i, j)),
            scratch_shapes=scratch,
        ),
        compiler_params=pltpu.CompilerParams(
            dimension_semantics=("parallel", "parallel", "arbitrary")),
    )(*args)
    return out[:M, :N]


# ----------------------------------------------------------------------------
# Memoized, jitted conv / linear entry points
# ----------------------------------------------------------------------------

_CONV_CACHE = {}
_LIN_CACHE = {}


def im2col(x, kh, kw, stride, pad):
    """x: [B,H,W,C] NHWC -> (patches [B*Ho*Wo, kh*kw*C], (B,Ho,Wo))."""
    if pad > 0:
        x = jnp.pad(x, ((0, 0), (pad, pad), (pad, pad), (0, 0)))
    B, H, W, C = x.shape
    Ho = (H - kh) // stride + 1
    Wo = (W - kw) // stride + 1
    cols = []
    for i in range(kh):
        for j in range(kw):
            cols.append(x[:, i::stride, j::stride, :][:, :Ho, :Wo, :])
    patches = jnp.concatenate(cols, axis=-1)
    return patches.reshape(B * Ho * Wo, kh * kw * C), (B, Ho, Wo)


def _build_conv_fn(prep, stride, pad, relu, has_res, out_dtype):
    kh, kw, cin = prep["kh"], prep["kw"], prep["cin"]
    K, N, Kp, Np = prep["k"], prep["n"], prep["kp"], prep["np"]

    def conv_fn(x, w, b, *maybe_res):
        res = maybe_res[0] if has_res else None
        if kh == 1 and kw == 1:
            xs = x if stride == 1 else x[:, ::stride, ::stride, :]
            B, Ho, Wo, _ = xs.shape
            patches = xs.reshape(B * Ho * Wo, cin).astype(jnp.bfloat16)
        else:
            # TODO(synk): 3x3/7x7 convs still materialize the im2col patch matrix in
            # bf16; an implicit-GEMM index_map walking the taps would keep HBM ~1x.
            patches, (B, Ho, Wo) = im2col(x.astype(jnp.bfloat16), kh, kw, stride, pad)
        res2d = None if res is None else res.reshape(B * Ho * Wo, N)
        y = _gemm(patches, w, b, res2d, M=B * Ho * Wo, K=K, N=N, Kp=Kp, Np=Np,
                  relu=relu, out_dtype=out_dtype)
        return y.reshape(B, Ho, Wo, N)

    return jax.jit(conv_fn)


def conv2d(x, prep, *, stride=1, pad=0, relu=False, residual=None,
           out_dtype=jnp.bfloat16):
    """Conv as GEMM.  x NHWC.  residual + ReLU fused into the GEMM epilogue."""
    has_res = residual is not None
    key = ("conv", tuple(x.shape), str(x.dtype), prep["kh"], prep["kw"],
           prep["cin"], prep["cout"], prep["kp"], prep["np"],
           stride, pad, relu, has_res, jnp.dtype(out_dtype).name)
    fn = _CONV_CACHE.get(key)
    if fn is None:
        fn = _build_conv_fn(prep, stride, pad, relu, has_res, out_dtype)
        _CONV_CACHE[key] = fn
    args = (x, prep["w"], prep["b"]) + ((residual,) if has_res else ())
    return fn(*args)


def pallas_linear(x, prep, *, relu=False, out_dtype=jnp.float32):
    """y = [relu](x @ W + b); x:[M,K], W pre-folded/padded bf16 [Kp,Np]."""
    M, K = x.shape
    key = ("lin", M, K, prep["n"], prep["kp"], prep["np"], relu,
           str(x.dtype), jnp.dtype(out_dtype).name)
    fn = _LIN_CACHE.get(key)
    if fn is None:
        N, Kp, Np = prep["n"], prep["kp"], prep["np"]

        def lin_fn(xx, w, b):
            return _gemm(xx.astype(jnp.bfloat16), w, b, None, M=M, K=K, N=N,
                         Kp=Kp, Np=Np, relu=relu, out_dtype=out_dtype)

        fn = jax.jit(lin_fn)
        _LIN_CACHE[key] = fn
    return fn(x, prep["w"], prep["b"])


# ----------------------------------------------------------------------------
# Pooling / loss wrappers
# ----------------------------------------------------------------------------

@jax.jit
def maxpool_3x3_s2_p1(x):
    """MaxPool2d(kernel=3, stride=2, padding=1) on NHWC via one Pallas kernel."""
    B, H, W, C = x.shape
    assert H % 2 == 0 and W % 2 == 0
    Ho, Wo = H // 2, W // 2
    xp = jnp.pad(x, ((0, 0), (1, 1), (1, 1), (0, 0)), constant_values=-jnp.inf)
    ee = xp[:, 0::2, 0::2, :]   # [B, Ho+1, Wo+1, C]
    eo = xp[:, 0::2, 1::2, :]
    oe = xp[:, 1::2, 0::2, :]
    oo = xp[:, 1::2, 1::2, :]
    spec_in = pl.BlockSpec((1, Ho + 1, Wo + 1, C), lambda b: (b, 0, 0, 0))
    return pl.pallas_call(
        functools.partial(_maxpool_kernel, ho=Ho, wo=Wo),
        out_shape=jax.ShapeDtypeStruct((B, Ho, Wo, C), x.dtype),
        grid=(B,),
        in_specs=[spec_in, spec_in, spec_in, spec_in],
        out_specs=pl.BlockSpec((1, Ho, Wo, C), lambda b: (b, 0, 0, 0)),
        compiler_params=pltpu.CompilerParams(dimension_semantics=("arbitrary",)),
    )(ee, eo, oe, oo)


def pallas_avgpool49(x):
    """x: [R, 49, C] (bf16 ok) -> [R, C] f32 mean over the 49 spatial positions."""
    R, S, C = x.shape
    TR = 16
    Rp = _round_up(R, TR)
    if Rp != R:
        x = jnp.pad(x, ((0, Rp - R), (0, 0), (0, 0)))
    out = pl.pallas_call(
        _avgpool49_kernel,
        out_shape=jax.ShapeDtypeStruct((Rp, C), jnp.float32),
        grid=(Rp // TR,),
        in_specs=[pl.BlockSpec((TR, S, C), lambda i: (i, 0, 0))],
        out_specs=pl.BlockSpec((TR, C), lambda i: (i, 0)),
        compiler_params=pltpu.CompilerParams(dimension_semantics=("parallel",)),
    )(x)
    return out[:R]


def pallas_cross_entropy(logits, onehot):
    """Mean softmax cross-entropy.  logits:[R,C], onehot:[R,C] -> shape [1]."""
    R, C = logits.shape
    out = pl.pallas_call(
        _ce_kernel,
        out_shape=jax.ShapeDtypeStruct((1, 1), jnp.float32),
        grid=(1,),
        in_specs=[pl.BlockSpec((R, C), lambda i: (0, 0)),
                  pl.BlockSpec((R, C), lambda i: (0, 0))],
        out_specs=pl.BlockSpec((1, 1), lambda i: (0, 0)),
    )(logits.astype(jnp.float32), onehot.astype(jnp.float32))
    return out.reshape(1)


# ----------------------------------------------------------------------------
# Parameter construction (deterministic numpy, BN folded + padded + bf16 once)
# ----------------------------------------------------------------------------

def make_prepared_params(seed=0, final_dim=1024):
    rng = np.random.default_rng(seed)

    def conv_w(kh, kw, cin, cout):
        fan_in = kh * kw * cin
        return (rng.standard_normal((kh, kw, cin, cout)) *
                np.sqrt(2.0 / fan_in)).astype(np.float32)

    def bn_p(c):
        gamma = (1.0 + 0.1 * rng.standard_normal(c)).astype(np.float32)
        beta = (0.1 * rng.standard_normal(c)).astype(np.float32)
        mean = (0.1 * rng.standard_normal(c)).astype(np.float32)
        var = (1.0 + 0.1 * rng.random(c)).astype(np.float32)
        return gamma, beta, mean, var

    def fold_bn(w_hwio, bn, eps=1e-5):
        gamma, beta, mean, var = bn
        scale = gamma / np.sqrt(var + eps)
        return w_hwio * scale, beta - mean * scale

    def prep_gemm(w_kn, bias):
        K, N = w_kn.shape
        Kp, Np = _round_up(K, 128), _round_up(N, 128)
        wp = np.zeros((Kp, Np), np.float32)
        wp[:K, :N] = w_kn
        bp = np.zeros((1, Np), np.float32)
        bp[0, :N] = bias
        return {"w": jnp.asarray(wp).astype(jnp.bfloat16),
                "b": jnp.asarray(bp),
                "k": K, "n": N, "kp": Kp, "np": Np}

    def prep_conv(w_hwio, bias):
        kh, kw, cin, cout = w_hwio.shape
        d = prep_gemm(w_hwio.reshape(kh * kw * cin, cout), bias)
        d.update(kh=kh, kw=kw, cin=cin, cout=cout)
        return d

    def conv_bn(kh, kw, cin, cout):
        return prep_conv(*fold_bn(conv_w(kh, kw, cin, cout), bn_p(cout)))

    def bottleneck(cin, cmid, cout, downsample):
        blk = {"g1": conv_bn(1, 1, cin, cmid),
               "g2": conv_bn(3, 3, cmid, cmid),
               "g3": conv_bn(1, 1, cmid, cout)}
        if downsample:
            blk["gds"] = conv_bn(1, 1, cin, cout)
        return blk

    def layer(cin, cmid, cout, nblocks):
        blocks = [bottleneck(cin, cmid, cout, True)]
        for _ in range(nblocks - 1):
            blocks.append(bottleneck(cout, cmid, cout, False))
        return blocks

    q = {"conv1": conv_bn(7, 7, 3, 64)}
    q["layer1"] = layer(64, 64, 256, 3)
    q["layer2"] = layer(256, 128, 512, 4)
    q["layer3"] = layer(512, 256, 1024, 6)
    q["layer4"] = layer(1024, 512, 2048, 3)
    # mask_upsample: Conv2d(1, 32, 3, stride=2, padding=1, bias=True)
    q["mask"] = prep_conv(conv_w(3, 3, 1, 32),
                          (0.01 * rng.standard_normal(32)).astype(np.float32))
    # object_embed: Embedding(81, 128)
    q["obj_embed"] = jnp.asarray((0.02 * rng.standard_normal((81, 128))).astype(np.float32))
    # regularizing_predictor: Linear(2048, 81)
    q["reg"] = prep_gemm((rng.standard_normal((2048, 81)) * np.sqrt(1.0 / 2048)).astype(np.float32),
                         (0.01 * rng.standard_normal(81)).astype(np.float32))
    # obj_downsample: Dropout(0.1) + Linear(2048 + 128, final_dim) + ReLU
    q["down"] = prep_gemm((rng.standard_normal((2048 + 128, final_dim)) *
                           np.sqrt(1.0 / 2176)).astype(np.float32),
                          (0.01 * rng.standard_normal(final_dim)).astype(np.float32))
    return q


# ----------------------------------------------------------------------------
# ResNet blocks (forward) — residual add + ReLU fused into conv3 epilogue
# ----------------------------------------------------------------------------

def bottleneck_forward(x, blk, c1_stride, ds_stride):
    out = conv2d(x, blk["g1"], stride=c1_stride, pad=0, relu=True)
    out = conv2d(out, blk["g2"], stride=1, pad=1, relu=True)
    if "gds" in blk:
        identity = conv2d(x, blk["gds"], stride=ds_stride, pad=0, relu=False)
    else:
        identity = x
    # conv3 + BN-folded bias + residual + ReLU all in one GEMM epilogue
    return conv2d(out, blk["g3"], stride=1, pad=0, relu=True, residual=identity)


def layer_forward(x, blocks, stride0):
    for i, blk in enumerate(blocks):
        s = stride0 if i == 0 else 1
        x = bottleneck_forward(x, blk, s, s)
    return x


# ----------------------------------------------------------------------------
# RoIAlign (torchvision semantics, aligned=False, sampling_ratio=0)
# TODO(synk): RoIAlign's per-ROI adaptive bilinear sampling has no clean dense
#             Pallas expression; kept as eager host-side glue (gather, not hot path).
# ----------------------------------------------------------------------------

def _bilinear(fmap, y, x, H, W):
    C = fmap.shape[0]
    if y < -1.0 or y > H or x < -1.0 or x > W:
        return np.zeros((C,), np.float32)
    y = max(y, 0.0)
    x = max(x, 0.0)
    y_low, x_low = int(y), int(x)
    if y_low >= H - 1:
        y_high = y_low = H - 1
        y = float(y_low)
    else:
        y_high = y_low + 1
    if x_low >= W - 1:
        x_high = x_low = W - 1
        x = float(x_low)
    else:
        x_high = x_low + 1
    ly, lx = y - y_low, x - x_low
    hy, hx = 1.0 - ly, 1.0 - lx
    return (hy * hx * fmap[:, y_low, x_low] + hy * lx * fmap[:, y_low, x_high]
            + ly * hx * fmap[:, y_high, x_low] + ly * lx * fmap[:, y_high, x_high])


def roi_align_np(feat_nchw, rois, output_size=7, spatial_scale=1.0 / 16, sampling_ratio=0):
    B, C, H, W = feat_nchw.shape
    R = rois.shape[0]
    out = np.zeros((R, C, output_size, output_size), np.float32)
    for r in range(R):
        b = int(rois[r, 0])
        x1, y1, x2, y2 = (rois[r, 1:] * spatial_scale).tolist()
        roi_w = max(x2 - x1, 1.0)
        roi_h = max(y2 - y1, 1.0)
        bin_h = roi_h / output_size
        bin_w = roi_w / output_size
        grid_h = sampling_ratio if sampling_ratio > 0 else int(np.ceil(roi_h / output_size))
        grid_w = sampling_ratio if sampling_ratio > 0 else int(np.ceil(roi_w / output_size))
        count = max(grid_h * grid_w, 1)
        fmap = feat_nchw[b]
        for ph in range(output_size):
            for pw in range(output_size):
                acc = np.zeros((C,), np.float32)
                for iy in range(grid_h):
                    y = y1 + ph * bin_h + (iy + 0.5) * bin_h / grid_h
                    for ix in range(grid_w):
                        x = x1 + pw * bin_w + (ix + 0.5) * bin_w / grid_w
                        acc += _bilinear(fmap, y, x, H, W)
                out[r, :, ph, pw] = acc / count
    return out


def pad_sequence_np(feats, lengths):
    D = feats.shape[-1]
    max_len = max(lengths)
    out = np.zeros((len(lengths), max_len, D), np.float32)
    start = 0
    for i, l in enumerate(lengths):
        out[i, :l] = feats[start:start + l]
        start += l
    return out


# ----------------------------------------------------------------------------
# SimpleDetector forward
# ----------------------------------------------------------------------------

def simple_detector_forward(q, images, boxes, box_mask, classes, segms):
    """images: [B,3,H,W] NCHW (PyTorch convention); returns dict like the module."""
    # ---- backbone: conv1 / bn1 / relu / maxpool / layer1 / layer2 / layer3 ----
    x = jnp.transpose(images.astype(jnp.float32), (0, 2, 3, 1)).astype(jnp.bfloat16)
    x = conv2d(x, q["conv1"], stride=2, pad=3, relu=True)
    x = maxpool_3x3_s2_p1(x)
    x = layer_forward(x, q["layer1"], 1)
    x = layer_forward(x, q["layer2"], 2)   # stride moved to conv1 (imagenet variant)
    x = layer_forward(x, q["layer3"], 2)
    img_feats = x                          # [B, H/16, W/16, 1024] bf16

    # ---- RoIAlign (eager host glue) ----
    box_mask_np = np.asarray(box_mask)
    box_inds = np.stack(np.nonzero(box_mask_np), axis=1)  # [R, 2]
    assert box_inds.shape[0] > 0
    boxes_np = np.asarray(boxes, np.float32)
    rois = np.concatenate(
        [box_inds[:, :1].astype(np.float32),
         boxes_np[box_inds[:, 0], box_inds[:, 1]]], axis=1)
    feat_nchw = np.asarray(
        jnp.transpose(img_feats, (0, 3, 1, 2)).astype(jnp.float32))
    roi_res = roi_align_np(feat_nchw, rois, 7, 1.0 / 16, 0)          # [R,1024,7,7]
    roi_res = jnp.transpose(jnp.asarray(roi_res), (0, 2, 3, 1))      # [R,7,7,1024]

    # ---- mask_upsample conv, added to first 32 channels ----
    segms_np = np.asarray(segms, np.float32)
    segms_indexed = segms_np[box_inds[:, 0], box_inds[:, 1]][..., None] - 0.5  # [R,14,14,1]
    mask_feats = conv2d(jnp.asarray(segms_indexed), q["mask"],
                        stride=2, pad=1, relu=False,
                        out_dtype=jnp.float32)                       # [R,7,7,32]
    roi_res = roi_res.at[..., :32].add(mask_feats)

    # ---- after_roi_align: layer4 + AvgPool2d(7) + Flatten ----
    x4 = layer_forward(roi_res.astype(jnp.bfloat16), q["layer4"], 1)  # [R,7,7,2048] bf16
    R = x4.shape[0]
    post_roialign = pallas_avgpool49(x4.reshape(R, 49, 2048))         # [R,2048] f32

    # ---- heads ----
    obj_logits = pallas_linear(post_roialign, q["reg"], relu=False,
                               out_dtype=jnp.float32)                 # [R,81]
    obj_labels = np.asarray(classes)[box_inds[:, 0], box_inds[:, 1]].astype(np.int32)
    onehot = jax.nn.one_hot(jnp.asarray(obj_labels), 81, dtype=jnp.float32)
    cnn_regularization = pallas_cross_entropy(obj_logits, onehot)     # [1]

    embed = q["obj_embed"][jnp.asarray(obj_labels)]                   # [R,128]
    feats_to_downsample = jnp.concatenate([post_roialign, embed], axis=-1)  # [R,2176]
    # TODO(synk): Dropout(p=0.1) is the identity in eval mode; train-mode drop not modeled.
    roi_aligned_feats = pallas_linear(feats_to_downsample, q["down"], relu=True,
                                      out_dtype=jnp.float32)          # [R,1024]

    lengths = box_mask_np.sum(1).astype(int).tolist()
    obj_reps = jnp.asarray(pad_sequence_np(np.asarray(roi_aligned_feats), lengths))

    return {
        "obj_reps_raw": post_roialign,
        "obj_reps": obj_reps,
        "obj_logits": obj_logits,
        "obj_labels": jnp.asarray(obj_labels),
        "cnn_regularization_loss": cnn_regularization,
    }


# ----------------------------------------------------------------------------
# main
# ----------------------------------------------------------------------------

if __name__ == "__main__":
    key = jax.random.PRNGKey(0)
    k_img, k_cls, k_seg = jax.random.split(key, 3)

    B, MAX_OBJ, IM = 2, 4, 64
    images = 0.5 * jax.random.normal(k_img, (B, 3, IM, IM), jnp.float32)     # NCHW
    boxes = jnp.asarray(np.array([
        [[2., 2., 40., 40.], [10., 8., 60., 56.], [0., 0., 63., 63.], [20., 24., 36., 44.]],
        [[4., 4., 30., 30.], [16., 0., 62., 30.], [8., 32., 56., 62.], [0., 0., 0., 0.]],
    ], np.float32))
    box_mask = jnp.asarray(np.array([[1, 1, 1, 1], [1, 1, 1, 0]], np.int32))
    classes = jax.random.randint(k_cls, (B, MAX_OBJ), 0, 81, jnp.int32)
    segms = jax.random.uniform(k_seg, (B, MAX_OBJ, 14, 14), jnp.float32)

    q = make_prepared_params(seed=0, final_dim=1024)   # BN fold + pad + bf16, once

    out = simple_detector_forward(q, images, boxes, box_mask, classes, segms)
    for v in out.values():
        jax.block_until_ready(v)

    assert out["obj_reps_raw"].shape == (7, 2048)
    assert out["obj_logits"].shape == (7, 81)
    assert out["obj_reps"].shape == (2, 4, 1024)
    assert out["cnn_regularization_loss"].shape == (1,)
    print("KERNEL_OK")
</pallas_src>

<mosaic_0001>
module attributes {stable_mosaic.version = 11 : i64} {
  func.func @_gemm_kernel(%arg0: i32, %arg1: i32, %arg2: i32, %arg3: memref<128x256xbf16, #tpu.memory_space<vmem>>, %arg4: memref<256x128xbf16, #tpu.memory_space<vmem>>, %arg5: memref<1x128xf32, #tpu.memory_space<vmem>>, %arg6: memref<128x128xbf16, #tpu.memory_space<vmem>>) attributes {dimension_semantics = [#tpu.dimension_semantics<parallel>, #tpu.dimension_semantics<parallel>, #tpu.dimension_semantics<arbitrary>], iteration_bounds = array<i64: 16, 1, 1>, scalar_prefetch = 0 : i64, scratch_operands = 0 : i64, tpu.core_type = #tpu.core_type<tc>, window_params = [{transform_indices = @transform_0, window_bounds = array<i64: 128, 256>}, {transform_indices = @transform_1, window_bounds = array<i64: 256, 128>}, {transform_indices = @transform_2, window_bounds = array<i64: 1, 128>}, {transform_indices = @transform_3, window_bounds = array<i64: 128, 128>}]} {
    %c0 = arith.constant 0 : index
    %c0_0 = arith.constant 0 : index
    %0 = vector.load %arg3[%c0, %c0_0] : memref<128x256xbf16, #tpu.memory_space<vmem>>, vector<128x256xbf16>
    %c0_1 = arith.constant 0 : index
    %c0_2 = arith.constant 0 : index
    %1 = vector.load %arg4[%c0_1, %c0_2] : memref<256x128xbf16, #tpu.memory_space<vmem>>, vector<256x128xbf16>
    %cst = arith.constant dense<0.000000e+00> : vector<128x128xf32>
    %2 = tpu.matmul %0, %1, %cst {dimension_numbers = #tpu.dot_dimension_numbers<[1], [0], [0], [1], [0, 0, 1, 1], [], []>} : vector<128x256xbf16>, vector<256x128xbf16>, vector<128x128xf32> -> vector<128x128xf32>
    %c0_3 = arith.constant 0 : index
    %c0_4 = arith.constant 0 : index
    %3 = vector.load %arg5[%c0_3, %c0_4] : memref<1x128xf32, #tpu.memory_space<vmem>>, vector<1x128xf32>
    %4 = vector.broadcast %3 : vector<1x128xf32> to vector<128x128xf32>
    %5 = arith.addf %2, %4 : vector<128x128xf32>
    %cst_5 = arith.constant 0.000000e+00 : f32
    %6 = vector.broadcast %cst_5 : f32 to vector<128x128xf32>
    %7 = arith.maximumf %5, %6 : vector<128x128xf32>
    %8 = arith.truncf %7 : vector<128x128xf32> to vector<128x128xbf16>
    %c0_6 = arith.constant 0 : index
    %c0_7 = arith.constant 0 : index
    %9 = vector.load %arg6[%c0_6, %c0_7] : memref<128x128xbf16, #tpu.memory_space<vmem>>, vector<128x128xbf16>
    tpu.vector_store %arg6[%c0_6, %c0_7], %8 {strides = array<i32>} : memref<128x128xbf16, #tpu.memory_space<vmem>>, vector<128x128xbf16>,
    return
  }
  func.func @transform_0(%arg0: i32, %arg1: i32, %arg2: i32) -> (i32, i32) {
    %c0_i32 = arith.constant 0 : i32
    return %arg0, %arg2 : i32, i32
  }
  func.func @transform_1(%arg0: i32, %arg1: i32, %arg2: i32) -> (i32, i32) {
    %c0_i32 = arith.constant 0 : i32
    return %arg2, %arg1 : i32, i32
  }
  func.func @transform_2(%arg0: i32, %arg1: i32, %arg2: i32) -> (i32, i32) {
    %c0_i32 = arith.constant 0 : i32
    %c0_i32_0 = arith.constant 0 : i32
    return %c0_i32, %arg1 : i32, i32
  }
  func.func @transform_3(%arg0: i32, %arg1: i32, %arg2: i32) -> (i32, i32) {
    %c0_i32 = arith.constant 0 : i32
    return %arg0, %arg1 : i32, i32
  }
}

</mosaic_0001>

<bundles_post_ra>
// kernel: conv_fn.1
= control target key start
LH: loop header
LB: loop body
LE: loop exit
PB: predicated region body
PF: predicated region fallthrough
CT: control target
= control target key end

     0   :  { %8 = vsyncpa [#allocation3], 0  ;;  %s1433_s0 = inlined_call_operand.vmem [shape: bf16[2048,256], index: 0, kind: input, shape index: {}]   ;;  %s1434_s1 = inlined_call_operand.vmem [shape: bf16[256,128], index: 1, kind: input, shape index: {}]   ;;  %s1435_s2 = inlined_call_operand.vmem [shape: f32[1,128], index: 2, kind: input, shape index: {}]   ;;  %s1436_s3 = inlined_call_operand.hbm [shape: bf16[2048,128], index: 3, kind: output, shape index: {}]  }
   0x1   :  { %10 = vsyncpa [#allocation3 + $0x1], 0  ;;  %s1218_s12 = smov 0   ;;  %s1220_s13 = smov 0  }
   0x2   :  { %s1222_s14 = smov 0   ;;  %s1224_s15 = smov 0  }
   0x3   :  { %s1226_s16 = smov 0   ;;  %s1228_s17 = smov 0  }
   0x4 LB: > { %s810_s18 = sadd.s32 4294967295, %s1193_s17   ;;  %s811_s19 = sadd.s32 4294967294, %s1193_s17   ;;  %s1193_s17 = sphi %s1228_s17, %s16_s17   ;;  %s1189_s16 = sphi %s1226_s16, %s1443_s16   ;;  %s1185_s15 = sphi %s1224_s15, %s1442_s15   ;;  %s1181_s14 = sphi %s1222_s14, %s1441_s14   ;;  %s1177_s13 = sphi %s1220_s13, %s1440_s13   ;;  %s1173_s12 = sphi %s1218_s12, %s1439_s12  }
   0x5   : > { %s35_s20 = sadd.s32 1, %s1189_s16  ;;  %s126_s21 = sadd.s32 1, %s1181_s14 }
   0x6   : > { %p37_p0 = scmp.ge.s32.totalorder %s35_s20, 16  ;;  %p136_p1 = scmp.ne.s32.totalorder %s1181_s14, %s1177_s13 }
   0x7   : > { %p137_p2 = scmp.eq.s32.totalorder %s810_s18, 15  ;;  %p142_p3 = scmp.ne.s32.totalorder %s1177_s13, %s1173_s12 }
   0x8   : > { %s1445_s20 = smov (%p37_p0, %s35_s20), 0  ;;  %p143_p5 = scmp.eq.s32.totalorder %s811_s19, 15 }
   0x9   : > { %p1258_p4 = por %p137_p2, %p136_p1  ;;  %s121_s23 = ssub.s32 %s1189_s16, %s1445_s20 }
   0xa   : > { %p816_p6 = scmp.ge.s32.totalorder %s1193_s17, 1  ;;  %p124_p7 = scmp.eq.s32.totalorder %s121_s23, 0 }
   0xb   : > { %p1265_p8 = por %p143_p5, %p142_p3  ;;  %p194_p9 = scmp.lt.s32.totalorder %s1193_s17, 17 }
   0xc   : > { %s1271_s25 = scalar_select %p124_p7, %s1181_s14, %s126_s21  }
   0xd   : > { %p195_p10 = pnand %p816_p6, %p194_p9 }
   0xe   : > { %s818_s28 = sshll.u32 (!%p195_p10), %s1185_s15, 4  ;;  %s1195_s19 = smov (!%p195_p10), [#allocation2]  }
   0xf   : > { %198 = sbr.rel (%p195_p10) target bundleno = 298 (0x12a), region = 32  ;;  %p236_p11 = scmp.lt.s32.totalorder (!%p195_p10), %s818_s28, 255 }
  0x10   : > { %s1121_s21 = sshll.u32 (!%p195_p10), %s1195_s19, 4  ;;  %s1122_s21 = int_to_ptr.vmem [resolvable:$false] %s1121_s21 }
  0x11   : > { %s1123_s23 = scalar_lea.vmem (!%p195_p10), %s1122_s21, 2048 }
  0x14   : > { %v1077_v0 = vld [vmem:[%s1434_s1 + $0x78] sm:$0xff]   ;;  %v1079_v2 = vld [vmem:[%s1434_s1 + $0x70] sm:$0xff]   ;;  %v1081_v4 = vld [vmem:[%s1434_s1 + $0x68] sm:$0xff]   ;;  %s1447_s28 = smov (!%p236_p11, %s818_s28), 255 }
  0x15   : > { %v1078_v1 = vld [vmem:[%s1434_s1 + $0x38] sm:$0xff]   ;;  %940 = vmatprep.subr.bf16.mxu0 %v1077_v0  ;;  %1004 = vmatprep.subr.bf16.mxu1 %v1077_v0  ;;  %v1080_v3 = vld [vmem:[%s1434_s1 + $0x30] sm:$0xff]   ;;  %v1082_v5 = vld [vmem:[%s1434_s1 + $0x28] sm:$0xff]   ;;  %s875_s26 = sshll.u32 %s1447_s28, 3  ;;  %s892_s28 = sshll.u32 %s1185_s15, 10 }
  0x16   : > { %941 = vmatpush3.bf16.msra.mxu0 %v1078_v1  ;;  %1012 = vmatpush3.bf16.msra.mxu1 %v1078_v1  ;;  %v1083_v6 = vld [vmem:[%s1434_s1 + $0x60] sm:$0xff]   ;;  %v1085_v8 = vld [vmem:[%s1434_s1 + $0x58] sm:$0xff]   ;;  %s1304_s5 = scalar_lea.vmem %s1433_s0, %s875_s26  ;;  %v1087_v10 = vld [vmem:[%s1434_s1 + $0x50] sm:$0xff]   ;;  %s1380_s11 = scalar_lea.hbm %s1436_s3, %s892_s28 }
  0x17   : > { %942 = vmatprep.subr.bf16.mxu0 %v1079_v2  ;;  %1005 = vmatprep.subr.bf16.mxu1 %v1079_v2  ;;  %v1084_v7 = vld [vmem:[%s1434_s1 + $0x20] sm:$0xff]   ;;  %v1086_v9 = vld [vmem:[%s1434_s1 + $0x18] sm:$0xff]   ;;  %v1088_v13 = vld [vmem:[%s1434_s1 + $0x10] sm:$0xff]  }
  0x18   : > { %v1095_v11 = vld [vmem:[%s1304_s5 + $0x4] ss:$8 sps:$4 sm:$0xff]   ;;  %v1093_v18 = vld [vmem:[%s1304_s5] ss:$8 sps:$4 sm:$0xff]   ;;  %v1099_v20 = vld [vmem:[%s1304_s5 + $0x14] ss:$8 sps:$4 sm:$0xff]  }
  0x19   : > { %v1098_v12 = vld [vmem:[%s1304_s5 + $0x44] ss:$8 sps:$4 sm:$0xff]   ;;  %523 = vmatprep.mubr.bf16.mxu0 %v1095_v11  ;;  %v1096_v19 = vld [vmem:[%s1304_s5 + $0x40] ss:$8 sps:$4 sm:$0xff]   ;;  %v1101_v21 = vld [vmem:[%s1304_s5 + $0x54] ss:$8 sps:$4 sm:$0xff]  }
  0x1a   : > { %943 = vmatpush3.bf16.msra.mxu0 %v1080_v3  ;;  %1013 = vmatpush3.bf16.msra.mxu1 %v1080_v3  ;;  %v1089_v14 = vld [vmem:[%s1434_s1 + $0x48] sm:$0xff]   ;;  %v1091_v16 = vld [vmem:[%s1434_s1 + $0x40] sm:$0xff]   ;;  %v1103_v22 = vld [vmem:[%s1304_s5 + $0x10] ss:$8 sps:$4 sm:$0xff]  }
  0x1b   : > { %944 = vmatprep.subr.bf16.mxu0 %v1081_v4  ;;  %1006 = vmatprep.subr.bf16.mxu1 %v1081_v4  ;;  %v1090_v15 = vld [vmem:[%s1434_s1 + $0x8] sm:$0xff]   ;;  %v1092_v17 = vld [vmem:[%s1434_s1] sm:$0xff]   ;;  %v1104_v23 = vld [vmem:[%s1304_s5 + $0x50] ss:$8 sps:$4 sm:$0xff]  }
  0x1c   : > { %555 = vmatprep.mubr.bf16.mxu1 %v1098_v12  ;;  %v1105_v24 = vld [vmem:[%s1304_s5 + $0x24] ss:$8 sps:$4 sm:$0xff]   ;;  %v1109_v26 = vld [vmem:[%s1304_s5 + $0x20] ss:$8 sps:$4 sm:$0xff]   ;;  %v1111_v28 = vld [vmem:[%s1304_s5 + $0x34] ss:$8 sps:$4 sm:$0xff]  }
  0x1d   : > { %v1107_v25 = vld [vmem:[%s1304_s5 + $0x64] ss:$8 sps:$4 sm:$0xff]   ;;  %v1110_v27 = vld [vmem:[%s1304_s5 + $0x60] ss:$8 sps:$4 sm:$0xff]   ;;  %v1113_v29 = vld [vmem:[%s1304_s5 + $0x74] ss:$8 sps:$4 sm:$0xff]  }
  0x1e   : > { %945 = vmatpush3.bf16.msra.mxu0 %v1082_v5  ;;  %1014 = vmatpush3.bf16.msra.mxu1 %v1082_v5  ;;  %v1115_v30 = vld [vmem:[%s1304_s5 + $0x30] ss:$8 sps:$4 sm:$0xff]   ;;  %v1346_v36 = vld [vmem:[%s1435_s2] ss:$0 sm:$0xff] }
  0x1f   : > { %946 = vmatprep.subr.bf16.mxu0 %v1083_v6  ;;  %1007 = vmatprep.subr.bf16.mxu1 %v1083_v6  ;;  %v1116_v31 = vld [vmem:[%s1304_s5 + $0x70] ss:$8 sps:$4 sm:$0xff]   ;;  %s231_s5 = sand.u32 1, %s1177_s13  }
  0x20   : > { %s817_s6 = sshll.u32 %s231_s5, 6  ;;  %s1388_s15 = scalar_lea.sflag [#allocation3], %s231_s5 }
  0x21   : > { %s1357_s7 = scalar_lea.vmem [#allocation2], %s817_s6 }
  0x22   : > { %947 = vmatpush3.bf16.msra.mxu0 %v1084_v7  ;;  %1015 = vmatpush3.bf16.msra.mxu1 %v1084_v7  ;;  %s699_s8 = sshll.u32 %s1357_s7, 4  ;;  %s1382_s8 = int_to_ptr.vmem [resolvable:$true] %s699_s8 }
  0x23   : > { %948 = vmatprep.subr.bf16.mxu0 %v1085_v8  ;;  %1008 = vmatprep.subr.bf16.mxu1 %v1085_v8  ;;  %s1117_s18 = scalar_lea.vmem %s1382_s8, 1024  ;;  %p1124_p1 = scmp.lt.s32.totalorder %s1382_s8, %s1122_s21 }
  0x24   : > { %p1118_p12 = scmp.ne.s32.totalorder %s1382_s8, %s1117_s18  ;;  %p1125_p2 = scmp.lt.s32.totalorder %s1123_s23, %s1117_s18 }
  0x26   : > { %949 = vmatpush3.bf16.msra.mxu0 %v1086_v9  ;;  %1016 = vmatpush3.bf16.msra.mxu1 %v1086_v9  ;;  %p1119_p13 = pnand %p1118_p12, %p1258_p4  ;;  %p1126_p3 = por %p1125_p2, %p1124_p1 }
  0x27   : > { %950 = vmatprep.subr.bf16.mxu0 %v1087_v10  ;;  %1009 = vmatprep.subr.bf16.mxu1 %v1087_v10 }
  0x28   : > { %p1120_p0 = pneg %p1119_p13 }
  0x2a   : > { %951 = vmatpush3.bf16.msra.mxu0 %v1088_v13  ;;  %1017 = vmatpush3.bf16.msra.mxu1 %v1088_v13  ;;  %p1127_p5 = pnand %p1126_p3, %p1120_p0 }
  0x2b   : > { %952 = vmatprep.subr.bf16.mxu0 %v1089_v14  ;;  %1010 = vmatprep.subr.bf16.mxu1 %v1089_v14 }
  0x2e   : > { %953 = vmatpush3.bf16.msra.mxu0 %v1090_v15  ;;  %1018 = vmatpush3.bf16.msra.mxu1 %v1090_v15 }
  0x2f   : > { %954 = vmatprep.subr.bf16.mxu0 %v1091_v16  ;;  %1011 = vmatprep.subr.bf16.mxu1 %v1091_v16 }
  0x32   : > { %955 = vmatpush3.bf16.msra.mxu0 %v1092_v17  ;;  %1019 = vmatpush3.bf16.msra.mxu1 %v1092_v17 }
  0x35   : > { %524 = vmatmul.mubr.bf16.vlgmr.msra.gmra.mxu0 %v1093_v18  ;;  %556 = vmatmul.mubr.bf16.vlgmr.msra.gmra.mxu1 %v1096_v19 }
  0x36   : > { %531 = vmatprep.mubr.bf16.mxu0 %v1099_v20  ;;  %563 = vmatprep.mubr.bf16.mxu1 %v1101_v21 }
  0x3d   : > { %532 = vmatmul.mubr.bf16.gmra.mxu0 %v1103_v22  ;;  %564 = vmatmul.mubr.bf16.gmra.mxu1 %v1104_v23 }
  0x3e   : > { %539 = vmatprep.mubr.bf16.mxu0 %v1105_v24  ;;  %571 = vmatprep.mubr.bf16.mxu1 %v1107_v25 }
  0x45   : > { %540 = vmatmul.mubr.bf16.gmra.mxu0 %v1109_v26  ;;  %572 = vmatmul.mubr.bf16.gmra.mxu1 %v1110_v27 }
  0x46   : > { %547 = vmatprep.mubr.bf16.mxu0 %v1111_v28  ;;  %579 = vmatprep.mubr.bf16.mxu1 %v1113_v29 }
  0x4d   : > { %548 = vmatmul.mubr.bf16.gmra.mxu0 %v1115_v30  ;;  %580 = vmatmul.mubr.bf16.gmra.mxu1 %v1116_v31 }
  0xf5   : > { %v956_v32 = vpop.f32.mrf.mxu0  ;;  %v980_v33 = vpop.f32.mrf.mxu1 }
  0xf7   : > { %v957_v34 = vpop.f32.mrf.mxu0  ;;  %v981_v35 = vpop.f32.mrf.mxu1 }
  0xf8   : > { %v958_v37 = vadd.f32 %v957_v34, %v956_v32  ;;  %v982_v38 = vadd.f32 %v981_v35, %v980_v33 }
  0xf9   : > { %v959_v39 = vpop.f32.mrf.mxu0  ;;  %v983_v40 = vpop.f32.mrf.mxu1 }
  0xfa   : > { %v526_v41 = vadd.f32 %v958_v37, %v1346_v36  ;;  %v558_v42 = vadd.f32 %v982_v38, %v1346_v36 }
  0xfb   : > { %v960_v43 = vpop.f32.mrf.mxu0  ;;  %v984_v44 = vpop.f32.mrf.mxu1 }
  0xfc   : > { %v961_v45 = vadd.f32 %v960_v43, %v959_v39  ;;  %v985_v46 = vadd.f32 %v984_v44, %v983_v40  ;;  %v588_v51 = vmax.f32 %v526_v41, 0.0  ;;  %v596_v52 = vmax.f32 %v558_v42, 0.0 }
  0xfd   : > { %v962_v47 = vpop.f32.mrf.mxu0  ;;  %v986_v48 = vpop.f32.mrf.mxu1 }
  0xfe   : > { %v529_v49 = vadd.f32 %v961_v45, %v1346_v36  ;;  %v561_v50 = vadd.f32 %v985_v46, %v1346_v36 }
  0xff   : > { %v963_v53 = vpop.f32.mrf.mxu0  ;;  %v987_v54 = vpop.f32.mrf.mxu1 }
 0x100   : > { %v589_v55 = vmax.f32 %v529_v49, 0.0  ;;  %v597_v56 = vmax.f32 %v561_v50, 0.0  ;;  %v964_v57 = vadd.f32 %v963_v53, %v962_v47  ;;  %v988_v58 = vadd.f32 %v987_v54, %v986_v48 }
 0x101   : > { %v965_v59 = vpop.f32.mrf.mxu0  ;;  %v989_v60 = vpop.f32.mrf.mxu1 }
 0x102   : > { %v896_v61 = vpack.c.bf16 %v589_v55, %v588_v51  ;;  %v916_v62 = vpack.c.bf16 %v597_v56, %v596_v52  ;;  %v534_v63 = vadd.f32 %v964_v57, %v1346_v36  ;;  %v566_v0 = vadd.f32 %v988_v58, %v1346_v36 }
 0x103   : > { %v966_v1 = vpop.f32.mrf.mxu0  ;;  %v990_v2 = vpop.f32.mrf.mxu1 }
 0x104   : > { %897 = vst [vmem:[%s1357_s7] sm:$0xff] %v896_v61   ;;  %936 = vst [vmem:[%s1357_s7 + $0x20] sm:$0xff] %v916_v62   ;;  %v967_v3 = vadd.f32 %v966_v1, %v965_v59  ;;  %v991_v4 = vadd.f32 %v990_v2, %v989_v60  ;;  %v590_v9 = vmax.f32 %v534_v63, 0.0  ;;  %v598_v10 = vmax.f32 %v566_v0, 0.0 }
 0x105   : > { %v968_v5 = vpop.f32.mrf.mxu0  ;;  %v992_v6 = vpop.f32.mrf.mxu1 }
 0x106   : > { %v537_v7 = vadd.f32 %v967_v3, %v1346_v36  ;;  %v569_v8 = vadd.f32 %v991_v4, %v1346_v36 }
 0x107   : > { %v969_v11 = vpop.f32.mrf.mxu0  ;;  %v993_v12 = vpop.f32.mrf.mxu1 }
 0x108   : > { %v591_v13 = vmax.f32 %v537_v7, 0.0  ;;  %v599_v14 = vmax.f32 %v569_v8, 0.0  ;;  %v970_v15 = vadd.f32 %v969_v11, %v968_v5  ;;  %v994_v16 = vadd.f32 %v993_v12, %v992_v6 }
 0x109   : > { %v971_v17 = vpop.f32.mrf.mxu0  ;;  %v995_v18 = vpop.f32.mrf.mxu1 }
 0x10a   : > { %v901_v19 = vpack.c.bf16 %v591_v13, %v590_v9  ;;  %v921_v20 = vpack.c.bf16 %v599_v14, %v598_v10  ;;  %v542_v21 = vadd.f32 %v970_v15, %v1346_v36  ;;  %v574_v22 = vadd.f32 %v994_v16, %v1346_v36 }
 0x10b   : > { %v972_v23 = vpop.f32.mrf.mxu0  ;;  %v996_v24 = vpop.f32.mrf.mxu1 }
 0x10c   : > { %933 = vst [vmem:[%s1357_s7 + $0x8] sm:$0xff] %v901_v19   ;;  %937 = vst [vmem:[%s1357_s7 + $0x28] sm:$0xff] %v921_v20   ;;  %v973_v25 = vadd.f32 %v972_v23, %v971_v17  ;;  %v997_v26 = vadd.f32 %v996_v24, %v995_v18  ;;  %v592_v31 = vmax.f32 %v542_v21, 0.0  ;;  %v600_v32 = vmax.f32 %v574_v22, 0.0 }
 0x10d   : > { %v974_v27 = vpop.f32.mrf.mxu0  ;;  %v998_v28 = vpop.f32.mrf.mxu1 }
 0x10e   : > { %v545_v29 = vadd.f32 %v973_v25, %v1346_v36  ;;  %v577_v30 = vadd.f32 %v997_v26, %v1346_v36 }
 0x10f   : > { %v975_v33 = vpop.f32.mrf.mxu0  ;;  %v999_v34 = vpop.f32.mrf.mxu1 }
 0x110   : > { %v593_v35 = vmax.f32 %v545_v29, 0.0  ;;  %v601_v37 = vmax.f32 %v577_v30, 0.0  ;;  %v976_v38 = vadd.f32 %v975_v33, %v974_v27  ;;  %v1000_v39 = vadd.f32 %v999_v34, %v998_v28 }
 0x111   : > { %v977_v40 = vpop.f32.mrf.mxu0  ;;  %v1001_v41 = vpop.f32.mrf.mxu1 }
 0x112   : > { %v906_v42 = vpack.c.bf16 %v593_v35, %v592_v31  ;;  %v926_v43 = vpack.c.bf16 %v601_v37, %v600_v32  ;;  %v550_v46 = vadd.f32 %v976_v38, %v1346_v36  ;;  %v582_v47 = vadd.f32 %v1000_v39, %v1346_v36 }
 0x113   : > { %v978_v44 = vpop.f32.mrf.mxu0  ;;  %v1002_v45 = vpop.f32.mrf.mxu1 }
 0x114   : > { %934 = vst [vmem:[%s1357_s7 + $0x10] sm:$0xff] %v906_v42   ;;  %938 = vst [vmem:[%s1357_s7 + $0x30] sm:$0xff] %v926_v43   ;;  %v979_v48 = vadd.f32 %v978_v44, %v977_v40  ;;  %v1003_v49 = vadd.f32 %v1002_v45, %v1001_v41  ;;  %v594_v52 = vmax.f32 %v550_v46, 0.0  ;;  %v602_v53 = vmax.f32 %v582_v47, 0.0 }
 0x116   : > { %v553_v50 = vadd.f32 %v979_v48, %v1346_v36  ;;  %v585_v51 = vadd.f32 %v1003_v49, %v1346_v36 }
 0x118   : > { %v595_v54 = vmax.f32 %v553_v50, 0.0  ;;  %v603_v55 = vmax.f32 %v585_v51, 0.0 }
 0x11a   : > { %v911_v56 = vpack.c.bf16 %v595_v54, %v594_v52  ;;  %v931_v57 = vpack.c.bf16 %v603_v55, %v602_v53 }
 0x11c   : > { %935 = vst [vmem:[%s1357_s7 + $0x18] sm:$0xff] %v911_v56   ;;  %939 = vst [vmem:[%s1357_s7 + $0x38] sm:$0xff] %v931_v57  }
 0x11d   : > { %1130 = shalt.err (!%p1127_p5)
}
 0x11e   : > { %s1131_s26 = scalar_lea.hbm %s1380_s11, 1024  ;;  %s1135_s30 = scalar_lea.hbm %s1436_s3, 16384 }
 0x11f   : > { %p1132_p6 = scmp.ne.s32.totalorder %s1380_s11, %s1131_s26  ;;  %p1136_p10 = scmp.lt.s32.totalorder %s1380_s11, %s1436_s3 }
 0x120   : > { %p1137_p11 = scmp.lt.s32.totalorder %s1135_s30, %s1131_s26 }
 0x121   : > { %p1133_p7 = pnand %p1132_p6, %p1258_p4 }
 0x122   : > { %p1138_p12 = por %p1137_p11, %p1136_p10 }
 0x123   : > { %p1134_p9 = pneg %p1133_p7 }
 0x125   : > { %p1139_p13 = pnand %p1138_p12, %p1134_p9 }
 0x127   : > { %1142 = shalt.err (!%p1139_p13)
}
 0x128   : > { %s1196_s6 = smov 64   ;;  %s1197_s7 = smov 4  }
 0x129   : > { %1020 = dma.vmem_to_hbm [thread:$0]  (%p1258_p4), %s1382_s8, 1024, %s1380_s11, %s1388_s15, %s1196_s6, %s1196_s6, %s1197_s7  }
 0x12a PF: > { %p1026_p0 = scmp.ge.s32.totalorder %s1193_s17, 2  ;;  %s714_s28 = sand.u32 1, %s1173_s12  }
 0x12b   : > { %s715_s9 = scalar_lea.sflag [#allocation3], %s714_s28 }
 0x12c   : > { %p1023_p1 = pnand %p1026_p0, %p1265_p8 }
 0x12e   : > { %p1024_p2 = pneg %p1023_p1 }
 0x130   : > { %1168 = dma.done.wait (%p1024_p2), %s715_s9, 1024  }
 0x131   : > { %1170 = vsyncadd (%p1024_p2), %s715_s9, 4294966272  ;;  %s16_s17 = sadd.s32 1, %s1193_s17   ;;  %s1439_s12 = smov %s1177_s13 }
 0x132   : > { %p13_p3 = scmp.ge.s32.totalorder %s16_s17, 18   ;;  %s1440_s13 = smov %s1181_s14 }
 0x133   : > { %s1441_s14 = smov %s1271_s25  ;;  %s1442_s15 = smov %s1189_s16 }
 0x134   : > { %s1443_s16 = smov %s1445_s20  ;;  %15 = sbr.rel (!%p13_p3) target bundleno = 4 (0x4), region = 73 }
 0x139   :  { %720 = vsyncpa [#allocation3], 1 }
 0x13a   :  { %722 = vsyncpa [#allocation3 + $0x1], 1 }

</bundles_post_ra>
